<compile_context>
chip_gen: v7x
topology: tpu7x:2x2x1
jax: 0.10.0
libtpu: 0.0.40
codegen_flags: <defaults>
</compile_context>

<pallas_src>
import jax
import jax.numpy as jnp
from jax.experimental import pallas as pl
from jax.experimental.pallas import tpu as pltpu

# ----------------------------- configuration ------------------------------
BATCH = 2          # b
GROUPS = 4         # g
SEQ = 16           # n  (axis that AdaptiveMaxPool1d(1) reduces over)
FEATURES = 32      # f  (num_features)


# ------------------------------- kernel -----------------------------------
def concat_pool_kernel(x_ref, o_ref):
    # x_ref: (B*G, N, F) fully resident in VMEM (gridless, full-array spec).
    # o_ref: (B*G, F).
    # out[bg, f] = max over n of x[bg, n, f] -- one cross-sublane max reduce.
    o_ref[...] = jnp.max(x_ref[...], axis=1)


# ------------------------------- wrapper -----------------------------------
@jax.jit
def concat_pool(x):
    B, G, N, F = x.shape

    # Free reshape (contiguous merge of the two leading dims) -- no transpose,
    # no data movement.
    x3 = x.reshape(B * G, N, F)

    y = pl.pallas_call(
        concat_pool_kernel,
        out_shape=jax.ShapeDtypeStruct((B * G, F), x.dtype),
        in_specs=[pl.BlockSpec(memory_space=pltpu.MemorySpace.VMEM)],
        out_specs=pl.BlockSpec(memory_space=pltpu.MemorySpace.VMEM),
    )(x3)

    # Free reshape back to the module's output layout.
    return y.reshape(B, G, F)


# --------------------------- pure-JAX reference ----------------------------
def concat_pool_ref(x):
    # out[b, g, f] = max over n of x[b, g, n, f]
    return jnp.max(x, axis=2)


# --------------------------------- main ------------------------------------
if __name__ == "__main__":
    key = jax.random.PRNGKey(0)
    x = jax.random.normal(key, (BATCH, GROUPS, SEQ, FEATURES), jnp.float32)

    out = jax.block_until_ready(concat_pool(x))

    ref = concat_pool_ref(x)
    assert out.shape == (BATCH, GROUPS, FEATURES)
    assert jnp.allclose(out, ref, atol=1e-6, rtol=1e-6), "mismatch vs reference"

    print("KERNEL_OK")
</pallas_src>

<mosaic_0001>
module attributes {stable_mosaic.version = 11 : i64} {
  func.func @concat_pool_kernel(%arg0: memref<8x16x32xf32, #tpu.memory_space<vmem>>, %arg1: memref<8x32xf32, #tpu.memory_space<vmem>>) attributes {dimension_semantics = [], scalar_prefetch = 0 : i64, scratch_operands = 0 : i64, tpu.core_type = #tpu.core_type<tc>} {
    %c0 = arith.constant 0 : index
    %c0_0 = arith.constant 0 : index
    %c0_1 = arith.constant 0 : index
    %0 = vector.load %arg0[%c0, %c0_0, %c0_1] : memref<8x16x32xf32, #tpu.memory_space<vmem>>, vector<8x16x32xf32>
    %cst = arith.constant dense<0xFF800000> : vector<8x32xf32>
    %1 = vector.multi_reduction <maximumf>, %0, %cst [1] : vector<8x16x32xf32> to vector<8x32xf32>
    %c0_2 = arith.constant 0 : index
    %c0_3 = arith.constant 0 : index
    %2 = vector.load %arg1[%c0_2, %c0_3] : memref<8x32xf32, #tpu.memory_space<vmem>>, vector<8x32xf32>
    tpu.vector_store %arg1[%c0_2, %c0_3], %1 {strides = array<i32>} : memref<8x32xf32, #tpu.memory_space<vmem>>, vector<8x32xf32>,
    return
  }
}

</mosaic_0001>

<bundles_post_ra>
// kernel: concat_pool.1
= control target key start
LH: loop header
LB: loop body
LE: loop exit
PB: predicated region body
PF: predicated region fallthrough
CT: control target
= control target key end

     0   :  { %6 = vsyncpa [#allocation3], 0  ;;  %s260_s0 = inlined_call_operand.hbm [shape: f32[8,16,32], index: 0, kind: input, shape index: {}]   ;;  %s261_s1 = inlined_call_operand.hbm [shape: f32[8,32], index: 1, kind: output, shape index: {}]  }
   0x1   :  { %7 = vsyncpa [#allocation4], 0  ;;  %s203_s6 = smov [#allocation2]   ;;  %s155_s10 = scalar_lea.hbm %s260_s0, 2048 }
   0x2   :  { %s13_s7 = sshll.u32 %s203_s6, 4  ;;  %p156_p0 = scmp.ne.s32.totalorder %s260_s0, %s155_s10  ;;  %s14_s7 = int_to_ptr.vmem [resolvable:$true] %s13_s7 }
   0x3   :  { %p159_p1 = scmp.lt.u32.totalorder %s155_s10, %s260_s0 }
   0x5   :  { %p161_p2 = pnand %p159_p1, %p156_p0 }
   0x7   :  { %164 = shalt.err (!%p161_p2)
}
   0x8   :  { %s165_s15 = scalar_lea.vmem %s14_s7, 2048  ;;  %p170_p4 = scmp.lt.s32.totalorder %s14_s7, %s14_s7 }
   0x9   :  { %p166_p3 = scmp.ne.s32.totalorder %s14_s7, %s165_s15  ;;  %p171_p5 = scmp.lt.s32.totalorder %s165_s15, %s165_s15 }
   0xb   :  { %p172_p6 = por %p171_p5, %p170_p4 }
   0xd   :  { %p173_p7 = pnand %p172_p6, %p166_p3 }
   0xf   :  { %176 = shalt.err (!%p173_p7)
}
  0x10   :  { %s204_s16 = smov 128   ;;  %s205_s17 = smov 8  }
  0x11   :  { %19 = dma.hbm_to_vmem [thread:$0]  %s260_s0, 2048, %s14_s7, [#allocation3], %s204_s16, %s204_s16, %s205_s17  }
  0x12   :  { %199 = dma.done.wait [#allocation3], 2048  }
  0x13   :  { %200 = vsyncadd [#allocation3], 4294965248  ;;  %vm39_vm0 = vcmask 261120   ;;  %v23_v0 = vld [vmem:[#allocation2] sm:$0xff]  ;;  %v24_v1 = vld [vmem:[#allocation2 + $0x8] sm:$0xff]  ;;  %vm120_vm1 = vcmask 1041409  }
  0x14   :  { %v25_v2 = vld [vmem:[#allocation2 + $0x10] sm:$0xff]  ;;  %v26_v3 = vld [vmem:[#allocation2 + $0x18] sm:$0xff]  ;;  %v27_v4 = vld [vmem:[#allocation2 + $0x20] sm:$0xff]  ;;  %v40_v6 = vsel %vm39_vm0, %v23_v0, -inf  ;;  %v41_v7 = vsel %vm39_vm0, %v24_v1, -inf  ;;  %vm122_vm2 = vcmask 1042434  }
  0x15   :  { %v28_v5 = vld [vmem:[#allocation2 + $0x28] sm:$0xff]  ;;  %v49_v8 = vsel %vm39_vm0, %v25_v2, -inf  ;;  %v29_v9 = vld [vmem:[#allocation2 + $0x30] sm:$0xff]  ;;  %v30_v10 = vld [vmem:[#allocation2 + $0x38] sm:$0xff]  ;;  %v42_v12 = vmax.f32 %v40_v6, %v41_v7  ;;  %v50_v13 = vsel %vm39_vm0, %v26_v3, -inf  ;;  %v58_v14 = vsel %vm39_vm0, %v27_v4, -inf }
  0x16   :  { %v31_v11 = vld [vmem:[#allocation2 + $0x40] sm:$0xff]  ;;  %v59_v15 = vsel %vm39_vm0, %v28_v5, -inf  ;;  %v32_v16 = vld [vmem:[#allocation2 + $0x48] sm:$0xff]  ;;  %v33_v17 = vld [vmem:[#allocation2 + $0x50] sm:$0xff]  ;;  %v51_v19 = vmax.f32 %v49_v8, %v50_v13  ;;  %v67_v21 = vsel %vm39_vm0, %v29_v9, -inf  ;;  %v68_v22 = vsel %vm39_vm0, %v30_v10, -inf }
  0x17   :  { %v34_v18 = vld [vmem:[#allocation2 + $0x58] sm:$0xff]  ;;  %v60_v20 = vmax.f32 %v58_v14, %v59_v15  ;;  %v35_v23 = vld [vmem:[#allocation2 + $0x60] sm:$0xff]  ;;  %v43_v24 = vrot.slane %v42_v12, 4  ;;  %v69_v25 = vmax.f32 %v67_v21, %v68_v22  ;;  %v76_v26 = vsel %vm39_vm0, %v31_v11, -inf  ;;  %v36_v28 = vld [vmem:[#allocation2 + $0x68] sm:$0xff]  ;;  %s206_s0 = smov [#allocation5]  }
  0x18   :  { %v77_v27 = vsel %vm39_vm0, %v32_v16, -inf  ;;  %v37_v29 = vld [vmem:[#allocation2 + $0x70] sm:$0xff]  ;;  %v52_v30 = vrot.slane %v51_v19, 4  ;;  %v85_v33 = vsel %vm39_vm0, %v33_v17, -inf  ;;  %v86_v36 = vsel %vm39_vm0, %v34_v18, -inf  ;;  %v38_v38 = vld [vmem:[#allocation2 + $0x78] sm:$0xff] }
  0x19   :  { %v61_v31 = vrot.slane %v60_v20, 4  ;;  %v78_v32 = vmax.f32 %v76_v26, %v77_v27  ;;  %v44_v34 = vmax.f32 %v42_v12, %v43_v24  ;;  %v70_v35 = vrot.slane %v69_v25, 4  ;;  %s142_s20 = sshll.u32 %s206_s0, 4  ;;  %s143_s20 = int_to_ptr.vmem [resolvable:$true] %s142_s20 }
  0x1a   :  { %v94_v37 = vsel %vm39_vm0, %v35_v23, -inf  ;;  %v53_v39 = vmax.f32 %v51_v19, %v52_v30  ;;  %v87_v42 = vmax.f32 %v85_v33, %v86_v36  ;;  %v95_v45 = vsel %vm39_vm0, %v36_v28, -inf  ;;  %s177_s21 = scalar_lea.vmem %s143_s20, 128  ;;  %p182_p9 = scmp.lt.s32.totalorder %s143_s20, %s143_s20 }
  0x1b   :  { %v62_v40 = vmax.f32 %v60_v20, %v61_v31  ;;  %v79_v41 = vrot.slane %v78_v32, 4  ;;  %v45_v43 = vrot.slane %v44_v34, 2  ;;  %v71_v44 = vmax.f32 %v69_v25, %v70_v35  ;;  %p178_p8 = scmp.ne.s32.totalorder %s143_s20, %s177_s21  ;;  %p183_p10 = scmp.lt.s32.totalorder %s177_s21, %s177_s21 }
  0x1c   :  { %v103_v46 = vsel %vm39_vm0, %v37_v29, -inf  ;;  %v54_v47 = vrot.slane %v53_v39, 2  ;;  %v88_v50 = vrot.slane %v87_v42, 4  ;;  %v96_v53 = vmax.f32 %v94_v37, %v95_v45 }
  0x1d   :  { %v63_v48 = vrot.slane %v62_v40, 2  ;;  %v80_v49 = vmax.f32 %v78_v32, %v79_v41  ;;  %v46_v51 = vmax.f32 %v44_v34, %v45_v43  ;;  %v72_v52 = vrot.slane %v71_v44, 2  ;;  %p184_p11 = por %p183_p10, %p182_p9 }
  0x1e   :  { %v104_v54 = vsel %vm39_vm0, %v38_v38, -inf  ;;  %v55_v55 = vmax.f32 %v53_v39, %v54_v47  ;;  %v89_v58 = vmax.f32 %v87_v42, %v88_v50  ;;  %v97_v61 = vrot.slane %v96_v53, 4 }
  0x1f   :  { %v64_v56 = vmax.f32 %v62_v40, %v63_v48  ;;  %v81_v57 = vrot.slane %v80_v49, 2  ;;  %v47_v59 = vrot.slane %v46_v51, 1  ;;  %v73_v60 = vmax.f32 %v71_v44, %v72_v52  ;;  %p185_p12 = pnand %p184_p11, %p178_p8 }
  0x20   :  { %v105_v62 = vmax.f32 %v103_v46, %v104_v54  ;;  %v56_v63 = vrot.slane %v55_v55, 1  ;;  %v90_v2 = vrot.slane %v89_v58, 2  ;;  %v98_v5 = vmax.f32 %v96_v53, %v97_v61 }
  0x21   :  { %v65_v0 = vrot.slane %v64_v56, 1  ;;  %v82_v1 = vmax.f32 %v80_v49, %v81_v57  ;;  %v48_v3 = vmax.f32 %v46_v51, %v47_v59  ;;  %v74_v4 = vrot.slane %v73_v60, 1 }
  0x22   :  { %v106_v6 = vrot.slane %v105_v62, 4  ;;  %v57_v7 = vmax.f32 %v55_v55, %v56_v63  ;;  %v91_v10 = vmax.f32 %v89_v58, %v90_v2  ;;  %v99_v12 = vrot.slane %v98_v5, 2 }
  0x23   :  { %v66_v8 = vmax.f32 %v64_v56, %v65_v0  ;;  %v83_v9 = vrot.slane %v82_v1, 1  ;;  %v75_v11 = vmax.f32 %v73_v60, %v74_v4  ;;  %vm124_vm3 = vcmask 1043459  }
  0x24   :  { %v107_v13 = vmax.f32 %v105_v62, %v106_v6  ;;  %v92_v15 = vrot.slane %v91_v10, 1  ;;  %v121_v16 = vsel %vm120_vm1, %v57_v7, %v48_v3  ;;  %vm126_vm4 = vcmask 1044484  }
  0x25   :  { %v84_v14 = vmax.f32 %v82_v1, %v83_v9  ;;  %v100_v17 = vmax.f32 %v98_v5, %v99_v12  ;;  %v123_v19 = vsel %vm122_vm2, %v66_v8, %v121_v16  ;;  %vm128_vm5 = vcmask 1045509  }
  0x26   :  { %v108_v18 = vrot.slane %v107_v13, 2  ;;  %v93_v20 = vmax.f32 %v91_v10, %v92_v15  ;;  %v125_v21 = vsel %vm124_vm3, %v75_v11, %v123_v19  ;;  %vm130_vm6 = vcmask 1046534  }
  0x27   :  { %v101_v22 = vrot.slane %v100_v17, 1  ;;  %v127_v24 = vsel %vm126_vm4, %v84_v14, %v125_v21  ;;  %vm132_vm7 = vcmask 1047559  }
  0x28   :  { %v109_v23 = vmax.f32 %v107_v13, %v108_v18  ;;  %v129_v25 = vsel %vm128_vm5, %v93_v20, %v127_v24 }
  0x29   :  { %v102_v26 = vmax.f32 %v100_v17, %v101_v22 }
  0x2a   :  { %v110_v27 = vrot.slane %v109_v23, 1 }
  0x2b   :  { %v131_v29 = vsel %vm130_vm6, %v102_v26, %v129_v25 }
  0x2c   :  { %v111_v28 = vmax.f32 %v109_v23, %v110_v27 }
  0x2e   :  { %v133_v30 = vsel %vm132_vm7, %v111_v28, %v131_v29 }
  0x2f   :  { %135 = vst.msk [vmem:[#allocation5] sm:$0xff] %vm39_vm0, %v133_v30 }
  0x30   :  { %188 = shalt.err (!%p185_p12)
}
  0x31   :  { %s189_s24 = scalar_lea.hbm %s261_s1, 128 }
  0x32   :  { %p190_p13 = scmp.ne.s32.totalorder %s261_s1, %s189_s24  ;;  %p193_p0 = scmp.lt.u32.totalorder %s189_s24, %s261_s1 }
  0x34   :  { %p195_p1 = pnand %p193_p0, %p190_p13 }
  0x36   :  { %198 = shalt.err (!%p195_p1)
}
  0x37   :  { %145 = dma.vmem_to_hbm [thread:$0]  %s143_s20, 128, %s261_s1, [#allocation4]  }
  0x38   :  { %201 = dma.done.wait [#allocation4], 128  }
  0x39   :  { %202 = vsyncadd [#allocation4], 4294967168 }
  0x3a   :  { %149 = vsyncpa [#allocation3], 1 }
  0x3b   :  { %150 = vsyncpa [#allocation4], 1 }

</bundles_post_ra>
